<compile_context>
chip_gen: v7x
topology: tpu7x:2x2x1
jax: 0.10.0
libtpu: 0.0.40
codegen_flags: <defaults>
</compile_context>

<pallas_src>
import functools

import jax
import jax.numpy as jnp
from jax.experimental import pallas as pl
from jax.experimental.pallas import tpu as pltpu

LANE = 128      # vreg lane width
SUBLANE = 8     # vreg sublane width


def _round_up(x, m):
    return ((x + m - 1) // m) * m


def _cdiv(a, b):
    return (a + b - 1) // b


def _pad_to(a, shape):
    """Zero-pad `a` up to `shape` (trailing pad on every axis)."""
    pads = [(0, s - d) for d, s in zip(a.shape, shape)]
    return jnp.pad(a, pads)


def _elu(x):
    # ELU (alpha=1). exp on min(x,0) avoids overflow on the discarded branch.
    return jnp.where(x > 0, x, jnp.exp(jnp.minimum(x, 0.0)) - 1.0)


# ----------------------------------------------------------------------------
# Kernel
# ----------------------------------------------------------------------------
def ode_net_kernel(x_ref, w_in_ref, b_in_ref,
                   wr1_ref, br1_ref, wr2_ref, br2_ref,
                   w_out_ref, b_out_ref, o_ref, *, num_blocks, matmul_dtype):
    # Cast only the matmul operands; accumulate in f32; keep elementwise f32.
    def mm(a, w):
        return jnp.dot(a.astype(matmul_dtype), w,
                       preferred_element_type=jnp.float32)

    # Input projection: [TB, n] @ [n, H_p] + [1, H_p]
    h = mm(x_ref[...], w_in_ref[...]) + b_in_ref[...]

    # Residual blocks (statically unrolled; num_blocks is a Python int).
    for r in range(num_blocks):
        t = mm(h, wr1_ref[r]) + br1_ref[r]          # (TB,H_p) + (1,H_p)
        t = _elu(t)
        t = mm(t, wr2_ref[r]) + br2_ref[r]
        h = h + t

    # Output projection: [TB, H_p] @ [H_p, n_p] + [1, n_p]
    o_ref[...] = (mm(h, w_out_ref[...]) + b_out_ref[...]).astype(o_ref.dtype)


# ----------------------------------------------------------------------------
# Parameters
# ----------------------------------------------------------------------------
def init_params(key, n, hidden, num_blocks):
    """Deterministic PyTorch-style init: U(-1/sqrt(fan_in), 1/sqrt(fan_in)).

    Weights are stored already transposed, so y = x @ W + b with
    W: [in_features, out_features].
    """
    def lin(k, fan_in, fan_out):
        kw, kb = jax.random.split(k)
        bound = 1.0 / jnp.sqrt(fan_in)
        w = jax.random.uniform(kw, (fan_in, fan_out), jnp.float32, -bound, bound)
        b = jax.random.uniform(kb, (fan_out,), jnp.float32, -bound, bound)
        return w, b

    keys = jax.random.split(key, 2 + 2 * num_blocks)
    w_in, b_in = lin(keys[0], n, hidden)
    w_out, b_out = lin(keys[1], hidden, n)

    wr1, br1, wr2, br2 = [], [], [], []
    for r in range(num_blocks):
        w1, b1 = lin(keys[2 + 2 * r], hidden, hidden)
        w2, b2 = lin(keys[3 + 2 * r], hidden, hidden)
        wr1.append(w1); br1.append(b1); wr2.append(w2); br2.append(b2)

    return {
        "w_in": w_in, "b_in": b_in,
        "wr1": jnp.stack(wr1), "br1": jnp.stack(br1),
        "wr2": jnp.stack(wr2), "br2": jnp.stack(br2),
        "w_out": w_out, "b_out": b_out,
    }


def prepare_params(params, matmul_dtype=jnp.bfloat16):
    """Pad hidden / output feature dims to the 128-lane width; cast matmul
    weights (bf16 by default -> MXU-native on v5e/v6e/v7x, f32 accumulation).

    Zero weight columns/rows + zero bias padding keep the padded lanes exactly
    zero through every residual block (ELU(0)=0), so results are unaffected
    after slicing the padding off again.  The input feature dim of w_in stays
    unpadded (n): the x block uses the full-dim exception, so no wrapper-side
    pad of x is needed.
    """
    n, H = params["w_in"].shape
    R = params["wr1"].shape[0]
    n_p = _round_up(n, LANE)
    H_p = _round_up(H, LANE)

    padded = {
        "w_in":  _pad_to(params["w_in"], (n, H_p)).astype(matmul_dtype),
        "b_in":  _pad_to(params["b_in"].reshape(1, H), (1, H_p)),
        "wr1":   _pad_to(params["wr1"], (R, H_p, H_p)).astype(matmul_dtype),
        "br1":   _pad_to(params["br1"].reshape(R, 1, H), (R, 1, H_p)),
        "wr2":   _pad_to(params["wr2"], (R, H_p, H_p)).astype(matmul_dtype),
        "br2":   _pad_to(params["br2"].reshape(R, 1, H), (R, 1, H_p)),
        "w_out": _pad_to(params["w_out"], (H_p, n_p)).astype(matmul_dtype),
        "b_out": _pad_to(params["b_out"].reshape(1, n), (1, n_p)),
    }
    meta = {"n": n, "H": H, "n_p": n_p, "H_p": H_p, "R": R,
            "matmul_dtype": matmul_dtype}
    return padded, meta


# ----------------------------------------------------------------------------
# Batch tiling: big tiles, even step count when split (v7x has 2 TensorCores)
# ----------------------------------------------------------------------------
def _choose_tiling(B, max_tb):
    B8 = _round_up(max(B, 1), SUBLANE)
    if B8 <= max_tb and B8 <= 2 * max(max_tb // 2, SUBLANE):
        if B8 <= 16 * SUBLANE:
            # Tiny batch: a single step; splitting would only add pipeline
            # overhead (~0.35us/step) for a few-microsecond kernel.
            return B8, B8, 1
    steps = max(2, _cdiv(B8, max_tb))
    if steps % 2:
        steps += 1                      # balance across the 2 TCs on v7x
    tb = _round_up(_cdiv(B8, steps), SUBLANE)
    return tb, tb * steps, steps


# ----------------------------------------------------------------------------
# Forward wrapper
# ----------------------------------------------------------------------------
def ode_net_forward(x, padded, meta, *, max_tb=512):
    """x: [B, n] float32. padded/meta: from prepare_params."""
    B, n = x.shape
    n_p, H_p, R = meta["n_p"], meta["H_p"], meta["R"]
    assert n == meta["n"]

    tb, B_p, steps = _choose_tiling(B, max_tb)
    x_p = _pad_to(x, (B_p, n))          # batch pad only; feature dim unpadded
    grid = (steps,)

    kernel = functools.partial(ode_net_kernel, num_blocks=R,
                               matmul_dtype=meta["matmul_dtype"])

    # Weights: full-array blocks, constant index_map, SINGLE-buffered
    # (block index never changes, so double-buffering only wastes VMEM).
    def const_spec(shape):
        return pl.BlockSpec(shape, lambda i, _nd=len(shape): (0,) * _nd,
                            pipeline_mode=pl.Buffered(1))

    in_specs = [
        pl.BlockSpec((tb, n), lambda i: (i, 0)),        # x (full-dim last axis)
        const_spec((n, H_p)),                           # w_in
        const_spec((1, H_p)),                           # b_in
        const_spec((R, H_p, H_p)),                      # wr1
        const_spec((R, 1, H_p)),                        # br1
        const_spec((R, H_p, H_p)),                      # wr2
        const_spec((R, 1, H_p)),                        # br2
        const_spec((H_p, n_p)),                         # w_out
        const_spec((1, n_p)),                           # b_out
    ]
    out_specs = pl.BlockSpec((tb, n_p), lambda i: (i, 0))   # lane-dense stores

    args = (x_p, padded["w_in"], padded["b_in"],
            padded["wr1"], padded["br1"], padded["wr2"], padded["br2"],
            padded["w_out"], padded["b_out"])

    # VMEM budget from the actual resident set (weights single-buffered,
    # x/out tiles double-buffered, f32 intermediates), with 2x headroom.
    weight_bytes = sum(int(a.size) * a.dtype.itemsize for a in args[1:])
    io_bytes = 2 * (tb * n * 4 + tb * n_p * 4)
    interm_bytes = 4 * tb * H_p * 4
    vmem_limit = int(min(max(2 * (weight_bytes + io_bytes + interm_bytes)
                             + (4 << 20), 16 << 20), 60 << 20))

    flops = 2 * B_p * (n * H_p + 2 * R * H_p * H_p + H_p * n_p)
    transcendentals = B_p * R * H_p                       # one exp per ELU elem
    bytes_accessed = (int(x_p.size) * x_p.dtype.itemsize
                      + B_p * n_p * 4
                      + weight_bytes)

    out_p = pl.pallas_call(
        kernel,
        out_shape=jax.ShapeDtypeStruct((B_p, n_p), jnp.float32),
        grid=grid,
        in_specs=in_specs,
        out_specs=out_specs,
        compiler_params=pltpu.CompilerParams(
            dimension_semantics=("parallel",),   # shard batch steps across TCs
            vmem_limit_bytes=vmem_limit,
        ),
        cost_estimate=pl.CostEstimate(
            flops=flops,
            transcendentals=transcendentals,
            bytes_accessed=bytes_accessed,
        ),
    )(*args)

    return out_p[:B, :n]


# ----------------------------------------------------------------------------
# Pure-JAX reference (f32, unpadded)
# ----------------------------------------------------------------------------
def ode_net_ref(x, params):
    h = x @ params["w_in"] + params["b_in"]
    R = params["wr1"].shape[0]
    for r in range(R):
        t = h @ params["wr1"][r] + params["br1"][r]
        t = jnp.where(t > 0, t, jnp.exp(jnp.minimum(t, 0.0)) - 1.0)
        t = t @ params["wr2"][r] + params["br2"][r]
        h = h + t
    return h @ params["w_out"] + params["b_out"]


if __name__ == "__main__":
    # Shapes consistent with ODE_Net(n, num_residual_blocks, hidden_features).
    B = 8            # batch
    N = 16           # n (input/output feature dim)
    HIDDEN = 32      # hidden_features (module default 25; use 32 here)
    NUM_BLOCKS = 2   # num_residual_blocks

    key = jax.random.PRNGKey(0)
    kx, kp, kx2 = jax.random.split(key, 3)
    x = jax.random.normal(kx, (B, N), jnp.float32)
    params = init_params(kp, N, HIDDEN, NUM_BLOCKS)
    ref = ode_net_ref(x, params)

    # ---- f32 matmul path: exact check vs reference ----
    padded_f32, meta_f32 = prepare_params(params, matmul_dtype=jnp.float32)
    out_f32 = jax.block_until_ready(ode_net_forward(x, padded_f32, meta_f32))
    assert out_f32.shape == (B, N)
    assert jnp.allclose(out_f32, ref, atol=2e-4, rtol=2e-4), "f32 mismatch vs reference"

    # ---- default bf16 matmul path (f32 accumulation & elementwise) ----
    padded_bf16, meta_bf16 = prepare_params(params)      # bf16 by default
    out_bf16 = jax.block_until_ready(ode_net_forward(x, padded_bf16, meta_bf16))
    assert out_bf16.shape == (B, N)
    assert bool(jnp.all(jnp.isfinite(out_bf16)))
    assert jnp.allclose(out_bf16, ref, atol=5e-2, rtol=5e-2), "bf16 mismatch vs reference"

    # ---- larger batch: multi-step grid, even step count for the v7x TC pair ----
    B2 = 300
    x2 = jax.random.normal(kx2, (B2, N), jnp.float32)
    out2 = jax.block_until_ready(ode_net_forward(x2, padded_bf16, meta_bf16))
    ref2 = ode_net_ref(x2, params)
    assert out2.shape == (B2, N)
    assert jnp.allclose(out2, ref2, atol=5e-2, rtol=5e-2), "tiled bf16 mismatch"

    print("KERNEL_OK")
</pallas_src>

<mosaic_0001>
module attributes {stable_mosaic.version = 11 : i64} {
  func.func @ode_net_kernel(%arg0: i32, %arg1: memref<8x16xf32, #tpu.memory_space<vmem>>, %arg2: memref<16x128xf32, #tpu.memory_space<vmem>>, %arg3: memref<1x128xf32, #tpu.memory_space<vmem>>, %arg4: memref<2x128x128xf32, #tpu.memory_space<vmem>>, %arg5: memref<2x1x128xf32, #tpu.memory_space<vmem>>, %arg6: memref<2x128x128xf32, #tpu.memory_space<vmem>>, %arg7: memref<2x1x128xf32, #tpu.memory_space<vmem>>, %arg8: memref<128x128xf32, #tpu.memory_space<vmem>>, %arg9: memref<1x128xf32, #tpu.memory_space<vmem>>, %arg10: memref<8x128xf32, #tpu.memory_space<vmem>>) attributes {dimension_semantics = [#tpu.dimension_semantics<parallel>], iteration_bounds = array<i64: 1>, scalar_prefetch = 0 : i64, scratch_operands = 0 : i64, tpu.core_type = #tpu.core_type<tc>, window_params = [{transform_indices = @transform_0, window_bounds = array<i64: 8, 16>}, {pipeline_mode = #tpu.pipeline_mode<synchronous>, transform_indices = @transform_1, window_bounds = array<i64: 16, 128>}, {pipeline_mode = #tpu.pipeline_mode<synchronous>, transform_indices = @transform_2, window_bounds = array<i64: 1, 128>}, {pipeline_mode = #tpu.pipeline_mode<synchronous>, transform_indices = @transform_3, window_bounds = array<i64: 2, 128, 128>}, {pipeline_mode = #tpu.pipeline_mode<synchronous>, transform_indices = @transform_4, window_bounds = array<i64: 2, 1, 128>}, {pipeline_mode = #tpu.pipeline_mode<synchronous>, transform_indices = @transform_5, window_bounds = array<i64: 2, 128, 128>}, {pipeline_mode = #tpu.pipeline_mode<synchronous>, transform_indices = @transform_6, window_bounds = array<i64: 2, 1, 128>}, {pipeline_mode = #tpu.pipeline_mode<synchronous>, transform_indices = @transform_7, window_bounds = array<i64: 128, 128>}, {pipeline_mode = #tpu.pipeline_mode<synchronous>, transform_indices = @transform_8, window_bounds = array<i64: 1, 128>}, {transform_indices = @transform_9, window_bounds = array<i64: 8, 128>}]} {
    %c0 = arith.constant 0 : index
    %c0_0 = arith.constant 0 : index
    %0 = vector.load %arg1[%c0, %c0_0] : memref<8x16xf32, #tpu.memory_space<vmem>>, vector<8x16xf32>
    %c0_1 = arith.constant 0 : index
    %c0_2 = arith.constant 0 : index
    %1 = vector.load %arg2[%c0_1, %c0_2] : memref<16x128xf32, #tpu.memory_space<vmem>>, vector<16x128xf32>
    %cst = arith.constant dense<0.000000e+00> : vector<8x128xf32>
    %2 = tpu.matmul %0, %1, %cst {dimension_numbers = #tpu.dot_dimension_numbers<[1], [0], [0], [1], [0, 0, 1, 1], [], []>} : vector<8x16xf32>, vector<16x128xf32>, vector<8x128xf32> -> vector<8x128xf32>
    %c0_3 = arith.constant 0 : index
    %c0_4 = arith.constant 0 : index
    %3 = vector.load %arg3[%c0_3, %c0_4] : memref<1x128xf32, #tpu.memory_space<vmem>>, vector<1x128xf32>
    %4 = vector.broadcast %3 : vector<1x128xf32> to vector<8x128xf32>
    %5 = arith.addf %2, %4 : vector<8x128xf32>
    %c0_5 = arith.constant 0 : index
    %c0_6 = arith.constant 0 : index
    %c0_7 = arith.constant 0 : index
    %6 = vector.load %arg4[%c0_5, %c0_6, %c0_7] : memref<2x128x128xf32, #tpu.memory_space<vmem>>, vector<1x128x128xf32>
    %7 = vector.shape_cast %6 : vector<1x128x128xf32> to vector<128x128xf32>
    %cst_8 = arith.constant dense<0.000000e+00> : vector<8x128xf32>
    %8 = tpu.matmul %5, %7, %cst_8 {dimension_numbers = #tpu.dot_dimension_numbers<[1], [0], [0], [1], [0, 0, 1, 1], [], []>} : vector<8x128xf32>, vector<128x128xf32>, vector<8x128xf32> -> vector<8x128xf32>
    %c0_9 = arith.constant 0 : index
    %c0_10 = arith.constant 0 : index
    %c0_11 = arith.constant 0 : index
    %9 = vector.load %arg5[%c0_9, %c0_10, %c0_11] : memref<2x1x128xf32, #tpu.memory_space<vmem>>, vector<1x1x128xf32>
    %10 = vector.shape_cast %9 : vector<1x1x128xf32> to vector<1x128xf32>
    %11 = vector.broadcast %10 : vector<1x128xf32> to vector<8x128xf32>
    %12 = arith.addf %8, %11 : vector<8x128xf32>
    %cst_12 = arith.constant 0.000000e+00 : f32
    %13 = vector.broadcast %cst_12 : f32 to vector<8x128xf32>
    %14 = arith.cmpf ogt, %12, %13 : vector<8x128xf32>
    %cst_13 = arith.constant 0.000000e+00 : f32
    %15 = vector.broadcast %cst_13 : f32 to vector<8x128xf32>
    %16 = arith.minimumf %12, %15 : vector<8x128xf32>
    %17 = math.exp %16 : vector<8x128xf32>
    %cst_14 = arith.constant 1.000000e+00 : f32
    %18 = vector.broadcast %cst_14 : f32 to vector<8x128xf32>
    %19 = arith.subf %17, %18 : vector<8x128xf32>
    %20 = arith.select %14, %12, %19 : vector<8x128xi1>, vector<8x128xf32>
    %c0_15 = arith.constant 0 : index
    %c0_16 = arith.constant 0 : index
    %c0_17 = arith.constant 0 : index
    %21 = vector.load %arg6[%c0_15, %c0_16, %c0_17] : memref<2x128x128xf32, #tpu.memory_space<vmem>>, vector<1x128x128xf32>
    %22 = vector.shape_cast %21 : vector<1x128x128xf32> to vector<128x128xf32>
    %cst_18 = arith.constant dense<0.000000e+00> : vector<8x128xf32>
    %23 = tpu.matmul %20, %22, %cst_18 {dimension_numbers = #tpu.dot_dimension_numbers<[1], [0], [0], [1], [0, 0, 1, 1], [], []>} : vector<8x128xf32>, vector<128x128xf32>, vector<8x128xf32> -> vector<8x128xf32>
    %c0_19 = arith.constant 0 : index
    %c0_20 = arith.constant 0 : index
    %c0_21 = arith.constant 0 : index
    %24 = vector.load %arg7[%c0_19, %c0_20, %c0_21] : memref<2x1x128xf32, #tpu.memory_space<vmem>>, vector<1x1x128xf32>
    %25 = vector.shape_cast %24 : vector<1x1x128xf32> to vector<1x128xf32>
    %26 = vector.broadcast %25 : vector<1x128xf32> to vector<8x128xf32>
    %27 = arith.addf %23, %26 : vector<8x128xf32>
    %28 = arith.addf %5, %27 : vector<8x128xf32>
    %c1 = arith.constant 1 : index
    %c0_22 = arith.constant 0 : index
    %c0_23 = arith.constant 0 : index
    %29 = vector.load %arg4[%c1, %c0_22, %c0_23] : memref<2x128x128xf32, #tpu.memory_space<vmem>>, vector<1x128x128xf32>
    %30 = vector.shape_cast %29 : vector<1x128x128xf32> to vector<128x128xf32>
    %cst_24 = arith.constant dense<0.000000e+00> : vector<8x128xf32>
    %31 = tpu.matmul %28, %30, %cst_24 {dimension_numbers = #tpu.dot_dimension_numbers<[1], [0], [0], [1], [0, 0, 1, 1], [], []>} : vector<8x128xf32>, vector<128x128xf32>, vector<8x128xf32> -> vector<8x128xf32>
    %c1_25 = arith.constant 1 : index
    %c0_26 = arith.constant 0 : index
    %c0_27 = arith.constant 0 : index
    %32 = vector.load %arg5[%c1_25, %c0_26, %c0_27] : memref<2x1x128xf32, #tpu.memory_space<vmem>>, vector<1x1x128xf32>
    %33 = vector.shape_cast %32 : vector<1x1x128xf32> to vector<1x128xf32>
    %34 = vector.broadcast %33 : vector<1x128xf32> to vector<8x128xf32>
    %35 = arith.addf %31, %34 : vector<8x128xf32>
    %cst_28 = arith.constant 0.000000e+00 : f32
    %36 = vector.broadcast %cst_28 : f32 to vector<8x128xf32>
    %37 = arith.cmpf ogt, %35, %36 : vector<8x128xf32>
    %cst_29 = arith.constant 0.000000e+00 : f32
    %38 = vector.broadcast %cst_29 : f32 to vector<8x128xf32>
    %39 = arith.minimumf %35, %38 : vector<8x128xf32>
    %40 = math.exp %39 : vector<8x128xf32>
    %cst_30 = arith.constant 1.000000e+00 : f32
    %41 = vector.broadcast %cst_30 : f32 to vector<8x128xf32>
    %42 = arith.subf %40, %41 : vector<8x128xf32>
    %43 = arith.select %37, %35, %42 : vector<8x128xi1>, vector<8x128xf32>
    %c1_31 = arith.constant 1 : index
    %c0_32 = arith.constant 0 : index
    %c0_33 = arith.constant 0 : index
    %44 = vector.load %arg6[%c1_31, %c0_32, %c0_33] : memref<2x128x128xf32, #tpu.memory_space<vmem>>, vector<1x128x128xf32>
    %45 = vector.shape_cast %44 : vector<1x128x128xf32> to vector<128x128xf32>
    %cst_34 = arith.constant dense<0.000000e+00> : vector<8x128xf32>
    %46 = tpu.matmul %43, %45, %cst_34 {dimension_numbers = #tpu.dot_dimension_numbers<[1], [0], [0], [1], [0, 0, 1, 1], [], []>} : vector<8x128xf32>, vector<128x128xf32>, vector<8x128xf32> -> vector<8x128xf32>
    %c1_35 = arith.constant 1 : index
    %c0_36 = arith.constant 0 : index
    %c0_37 = arith.constant 0 : index
    %47 = vector.load %arg7[%c1_35, %c0_36, %c0_37] : memref<2x1x128xf32, #tpu.memory_space<vmem>>, vector<1x1x128xf32>
    %48 = vector.shape_cast %47 : vector<1x1x128xf32> to vector<1x128xf32>
    %49 = vector.broadcast %48 : vector<1x128xf32> to vector<8x128xf32>
    %50 = arith.addf %46, %49 : vector<8x128xf32>
    %51 = arith.addf %28, %50 : vector<8x128xf32>
    %c0_38 = arith.constant 0 : index
    %c0_39 = arith.constant 0 : index
    %52 = vector.load %arg8[%c0_38, %c0_39] : memref<128x128xf32, #tpu.memory_space<vmem>>, vector<128x128xf32>
    %cst_40 = arith.constant dense<0.000000e+00> : vector<8x128xf32>
    %53 = tpu.matmul %51, %52, %cst_40 {dimension_numbers = #tpu.dot_dimension_numbers<[1], [0], [0], [1], [0, 0, 1, 1], [], []>} : vector<8x128xf32>, vector<128x128xf32>, vector<8x128xf32> -> vector<8x128xf32>
    %c0_41 = arith.constant 0 : index
    %c0_42 = arith.constant 0 : index
    %54 = vector.load %arg9[%c0_41, %c0_42] : memref<1x128xf32, #tpu.memory_space<vmem>>, vector<1x128xf32>
    %55 = vector.broadcast %54 : vector<1x128xf32> to vector<8x128xf32>
    %56 = arith.addf %53, %55 : vector<8x128xf32>
    %c0_43 = arith.constant 0 : index
    %c0_44 = arith.constant 0 : index
    %57 = vector.load %arg10[%c0_43, %c0_44] : memref<8x128xf32, #tpu.memory_space<vmem>>, vector<8x128xf32>
    tpu.vector_store %arg10[%c0_43, %c0_44], %56 {strides = array<i32>} : memref<8x128xf32, #tpu.memory_space<vmem>>, vector<8x128xf32>,
    return
  }
  func.func @transform_0(%arg0: i32) -> (i32, i32) {
    %c0_i32 = arith.constant 0 : i32
    %c0_i32_0 = arith.constant 0 : i32
    return %arg0, %c0_i32 : i32, i32
  }
  func.func @transform_1(%arg0: i32) -> (i32, i32) {
    %c0_i32 = arith.constant 0 : i32
    %c0_i32_0 = arith.constant 0 : i32
    %c0_i32_1 = arith.constant 0 : i32
    return %c0_i32, %c0_i32_0 : i32, i32
  }
  func.func @transform_2(%arg0: i32) -> (i32, i32) {
    %c0_i32 = arith.constant 0 : i32
    %c0_i32_0 = arith.constant 0 : i32
    %c0_i32_1 = arith.constant 0 : i32
    return %c0_i32, %c0_i32_0 : i32, i32
  }
  func.func @transform_3(%arg0: i32) -> (i32, i32, i32) {
    %c0_i32 = arith.constant 0 : i32
    %c0_i32_0 = arith.constant 0 : i32
    %c0_i32_1 = arith.constant 0 : i32
    %c0_i32_2 = arith.constant 0 : i32
    return %c0_i32, %c0_i32_0, %c0_i32_1 : i32, i32, i32
  }
  func.func @transform_4(%arg0: i32) -> (i32, i32, i32) {
    %c0_i32 = arith.constant 0 : i32
    %c0_i32_0 = arith.constant 0 : i32
    %c0_i32_1 = arith.constant 0 : i32
    %c0_i32_2 = arith.constant 0 : i32
    return %c0_i32, %c0_i32_0, %c0_i32_1 : i32, i32, i32
  }
  func.func @transform_5(%arg0: i32) -> (i32, i32, i32) {
    %c0_i32 = arith.constant 0 : i32
    %c0_i32_0 = arith.constant 0 : i32
    %c0_i32_1 = arith.constant 0 : i32
    %c0_i32_2 = arith.constant 0 : i32
    return %c0_i32, %c0_i32_0, %c0_i32_1 : i32, i32, i32
  }
  func.func @transform_6(%arg0: i32) -> (i32, i32, i32) {
    %c0_i32 = arith.constant 0 : i32
    %c0_i32_0 = arith.constant 0 : i32
    %c0_i32_1 = arith.constant 0 : i32
    %c0_i32_2 = arith.constant 0 : i32
    return %c0_i32, %c0_i32_0, %c0_i32_1 : i32, i32, i32
  }
  func.func @transform_7(%arg0: i32) -> (i32, i32) {
    %c0_i32 = arith.constant 0 : i32
    %c0_i32_0 = arith.constant 0 : i32
    %c0_i32_1 = arith.constant 0 : i32
    return %c0_i32, %c0_i32_0 : i32, i32
  }
  func.func @transform_8(%arg0: i32) -> (i32, i32) {
    %c0_i32 = arith.constant 0 : i32
    %c0_i32_0 = arith.constant 0 : i32
    %c0_i32_1 = arith.constant 0 : i32
    return %c0_i32, %c0_i32_0 : i32, i32
  }
  func.func @transform_9(%arg0: i32) -> (i32, i32) {
    %c0_i32 = arith.constant 0 : i32
    %c0_i32_0 = arith.constant 0 : i32
    return %arg0, %c0_i32 : i32, i32
  }
}

</mosaic_0001>

<bundles_post_ra>
// kernel: tpu_custom_call.1
= control target key start
LH: loop header
LB: loop body
LE: loop exit
PB: predicated region body
PF: predicated region fallthrough
CT: control target
= control target key end

     0   :  { %14 = vsyncpa [#allocation3], 0  ;;  %s1467_s0 = inlined_call_operand.hbm [shape: f32[8,16], index: 0, kind: input, shape index: {}]   ;;  %s1468_s1 = inlined_call_operand.hbm [shape: f32[16,128], index: 1, kind: input, shape index: {}]   ;;  %s1469_s2 = inlined_call_operand.vmem [shape: f32[1,128], index: 2, kind: input, shape index: {}]   ;;  %s1470_s3 = inlined_call_operand.hbm [shape: f32[2,128,128], index: 3, kind: input, shape index: {}]   ;;  %s1471_s4 = inlined_call_operand.vmem [shape: f32[2,1,128], index: 4, kind: input, shape index: {}]   ;;  %s1472_s5 = inlined_call_operand.hbm [shape: f32[2,128,128], index: 5, kind: input, shape index: {}]   ;;  %s1473_s6 = inlined_call_operand.vmem [shape: f32[2,1,128], index: 6, kind: input, shape index: {}]   ;;  %s1474_s7 = inlined_call_operand.hbm [shape: f32[128,128], index: 7, kind: input, shape index: {}]   ;;  %s1475_s8 = inlined_call_operand.vmem [shape: f32[1,128], index: 8, kind: input, shape index: {}]   ;;  %s1476_s9 = inlined_call_operand.hbm [shape: f32[8,128], index: 9, kind: output, shape index: {}]  }
   0x1   :  { %15 = vsyncpa [#allocation6], 0 }
   0x2   :  { %16 = vsyncpa [#allocation9], 0 }
   0x3   :  { %17 = vsyncpa [#allocation4], 0  ;;  %s1243_s30 = smov [#allocation5]   ;;  %s1103_s13 = scalar_lea.hbm %s1468_s1, 256 }
   0x4   :  { %s33_s10 = sshll.u32 %s1243_s30, 4  ;;  %p1104_p0 = scmp.ne.s32.totalorder %s1468_s1, %s1103_s13  ;;  %s34_s10 = int_to_ptr.vmem [resolvable:$true] %s33_s10 }
   0x5   :  { %p1107_p1 = scmp.lt.u32.totalorder %s1103_s13, %s1468_s1 }
   0x7   :  { %p1109_p2 = pnand %p1107_p1, %p1104_p0 }
   0x9   :  { %1112 = shalt.err (!%p1109_p2)
}
   0xa   :  { %s1113_s18 = scalar_lea.vmem %s34_s10, 256  ;;  %p1118_p4 = scmp.lt.s32.totalorder %s34_s10, %s34_s10 }
   0xb   :  { %p1114_p3 = scmp.ne.s32.totalorder %s34_s10, %s1113_s18  ;;  %p1119_p5 = scmp.lt.s32.totalorder %s1113_s18, %s1113_s18 }
   0xd   :  { %p1120_p6 = por %p1119_p5, %p1118_p4 }
   0xf   :  { %p1121_p7 = pnand %p1120_p6, %p1114_p3 }
  0x11   :  { %1124 = shalt.err (!%p1121_p7)
}
  0x12   :  { %s1244_s19 = smov 128   ;;  %s1245_s20 = smov 8  }
  0x13   :  { %39 = dma.hbm_to_vmem [thread:$0]  %s1468_s1, 256, %s34_s10, [#allocation6], %s1244_s19, %s1244_s19, %s1245_s20  }
  0x14   :  { %s1246_s23 = smov [#allocation8]   ;;  %s1247_s25 = smov [#allocation2]  }
  0x15   :  { %s61_s24 = sshll.u32 %s1246_s23, 4  ;;  %s24_s26 = sshll.u32 %s1247_s25, 4  ;;  %s62_s24 = int_to_ptr.vmem [resolvable:$true] %s61_s24  ;;  %s25_s26 = int_to_ptr.vmem [resolvable:$true] %s24_s26 }
  0x16   :  { %s1125_s29 = scalar_lea.hbm %s1472_s5, 4096 }
  0x17   :  { %p1126_p8 = scmp.ne.s32.totalorder %s1472_s5, %s1125_s29  ;;  %p1129_p9 = scmp.lt.u32.totalorder %s1125_s29, %s1472_s5 }
  0x19   :  { %p1131_p10 = pnand %p1129_p9, %p1126_p8 }
  0x1b   :  { %1134 = shalt.err (!%p1131_p10)
}
  0x1c   :  { %s1135_s1 = scalar_lea.vmem %s62_s24, 4096  ;;  %p1140_p12 = scmp.lt.s32.totalorder %s62_s24, %s62_s24 }
  0x1d   :  { %p1136_p11 = scmp.ne.s32.totalorder %s62_s24, %s1135_s1  ;;  %p1141_p13 = scmp.lt.s32.totalorder %s1135_s1, %s1135_s1 }
  0x1f   :  { %p1142_p0 = por %p1141_p13, %p1140_p12 }
  0x21   :  { %p1143_p1 = pnand %p1142_p0, %p1136_p11 }
  0x23   :  { %1146 = shalt.err (!%p1143_p1)
}
  0x24   :  { %67 = dma.hbm_to_vmem [thread:$0]  %s1472_s5, 4096, %s62_s24, [#allocation9], %s1244_s19, %s1244_s19, %s1245_s20  }
  0x25   :  { %s1147_s17 = scalar_lea.hbm %s1467_s0, 128 }
  0x26   :  { %p1148_p2 = scmp.ne.s32.totalorder %s1467_s0, %s1147_s17  ;;  %p1151_p3 = scmp.lt.u32.totalorder %s1147_s17, %s1467_s0 }
  0x28   :  { %p1153_p4 = pnand %p1151_p3, %p1148_p2 }
  0x2a   :  { %1156 = shalt.err (!%p1153_p4)
}
  0x2b   :  { %s1157_s25 = scalar_lea.vmem %s25_s26, 128  ;;  %p1162_p6 = scmp.lt.s32.totalorder %s25_s26, %s25_s26 }
  0x2c   :  { %p1158_p5 = scmp.ne.s32.totalorder %s25_s26, %s1157_s25  ;;  %p1163_p7 = scmp.lt.s32.totalorder %s1157_s25, %s1157_s25 }
  0x2e   :  { %p1164_p8 = por %p1163_p7, %p1162_p6 }
  0x30   :  { %p1165_p9 = pnand %p1164_p8, %p1158_p5 }
  0x32   :  { %1168 = shalt.err (!%p1165_p9)
}
  0x33   :  { %27 = dma.hbm_to_vmem [thread:$0]  %s1467_s0, 128, %s25_s26, [#allocation3]  }
  0x34   :  { %s1248_s27 = smov [#allocation7]   ;;  %s1249_s29 = smov [#allocation10]  }
  0x35   :  { %s47_s28 = sshll.u32 %s1248_s27, 4  ;;  %s75_s30 = sshll.u32 %s1249_s29, 4  ;;  %s48_s28 = int_to_ptr.vmem [resolvable:$true] %s47_s28  ;;  %s76_s30 = int_to_ptr.vmem [resolvable:$true] %s75_s30 }
  0x36   :  { %s1169_s13 = scalar_lea.hbm %s1470_s3, 4096 }
  0x37   :  { %p1170_p10 = scmp.ne.s32.totalorder %s1470_s3, %s1169_s13  ;;  %p1173_p11 = scmp.lt.u32.totalorder %s1169_s13, %s1470_s3 }
  0x39   :  { %p1175_p12 = pnand %p1173_p11, %p1170_p10 }
  0x3b   :  { %1178 = shalt.err (!%p1175_p12)
}
  0x3c   :  { %s1179_s0 = scalar_lea.vmem %s48_s28, 4096  ;;  %p1184_p0 = scmp.lt.s32.totalorder %s48_s28, %s48_s28 }
  0x3d   :  { %p1180_p13 = scmp.ne.s32.totalorder %s48_s28, %s1179_s0  ;;  %p1185_p1 = scmp.lt.s32.totalorder %s1179_s0, %s1179_s0 }
  0x3f   :  { %p1186_p2 = por %p1185_p1, %p1184_p0 }
  0x41   :  { %p1187_p3 = pnand %p1186_p2, %p1180_p13 }
  0x43   :  { %1190 = shalt.err (!%p1187_p3)
}
  0x44   :  { %53 = dma.hbm_to_vmem [thread:$0]  %s1470_s3, 4096, %s48_s28, [#allocation6], %s1244_s19, %s1244_s19, %s1245_s20  }
  0x45   :  { %s1191_s21 = scalar_lea.hbm %s1474_s7, 2048 }
  0x46   :  { %p1192_p4 = scmp.ne.s32.totalorder %s1474_s7, %s1191_s21  ;;  %p1195_p5 = scmp.lt.u32.totalorder %s1191_s21, %s1474_s7 }
  0x48   :  { %p1197_p6 = pnand %p1195_p5, %p1192_p4 }
  0x4a   :  { %1200 = shalt.err (!%p1197_p6)
}
  0x4b   :  { %s1201_s24 = scalar_lea.vmem %s76_s30, 2048  ;;  %p1206_p8 = scmp.lt.s32.totalorder %s76_s30, %s76_s30 }
  0x4c   :  { %p1202_p7 = scmp.ne.s32.totalorder %s76_s30, %s1201_s24  ;;  %p1207_p9 = scmp.lt.s32.totalorder %s1201_s24, %s1201_s24 }
  0x4e   :  { %p1208_p10 = por %p1207_p9, %p1206_p8 }
  0x50   :  { %p1209_p11 = pnand %p1208_p10, %p1202_p7 }
  0x52   :  { %1212 = shalt.err (!%p1209_p11)
}
  0x53   :  { %81 = dma.hbm_to_vmem [thread:$0]  %s1474_s7, 2048, %s76_s30, [#allocation9], %s1244_s19, %s1244_s19, %s1245_s20  }
  0x54   :  { %1235 = dma.done.wait [#allocation3], 128  }
  0x55   :  { %1236 = vsyncadd [#allocation3], 4294967168 }
  0x56   :  { %1237 = dma.done.wait [#allocation6], 4352  }
  0x57   :  { %1238 = vsyncadd [#allocation6], 4294962944 }
  0x58   :  { %1239 = dma.done.wait [#allocation9], 6144  }
  0x59   :  { %1240 = vsyncadd [#allocation9], 4294961152  ;;  %v1250_v0 = vmov 0.0|0.0   ;;  %vm1251_vm0 = vmmov 0   ;;  %v1252_v1 = vmov 0.0   ;;  %v100_v2 = vld [vmem:[#allocation5] sm:$0xff] }
  0x5a   :  { %965 = vmatprep.subr.bf16.mxu0 %v1250_v0  ;;  %787 = vmatprep.mubr.msk.f32.mxu0 %vm1251_vm0, %v1252_v1  ;;  %v101_v3 = vld [vmem:[#allocation5 + $0x8] sm:$0xff]  ;;  %v183_v5 = vld [vmem:[#allocation7] sm:$0xff]  ;;  %v184_v6 = vld [vmem:[#allocation7 + $0x8] sm:$0xff]  ;;  %vm109_vm1 = vcmask 130048   ;;  %s1253_s10 = smov [#allocation11]  }
  0x5b   :  { %968 = vmatprep.subr.bf16.mxu1 %v1250_v0  ;;  %822 = vmatprep.mubr.msk.f32.mxu1 %vm1251_vm0, %v1252_v1  ;;  %v966_v4 = vpack.c.bf16 %v101_v3, %v100_v2  ;;  %v185_v7 = vld [vmem:[#allocation7 + $0x10] sm:$0xff]  ;;  %v969_v8 = vpack.c.bf16 %v184_v6, %v183_v5  ;;  %v186_v9 = vld [vmem:[#allocation7 + $0x18] sm:$0xff]  ;;  %v99_v10 = vld [vmem:[#allocation2] sm:$0xff]  ;;  %s673_s14 = sshll.u32 %s1253_s10, 4  ;;  %s674_s14 = int_to_ptr.vmem [resolvable:$true] %s673_s14 }
  0x5c   :  { %v972_v11 = vpack.c.bf16 %v186_v9, %v185_v7  ;;  %v187_v12 = vld [vmem:[#allocation7 + $0x20] sm:$0xff]  ;;  %v188_v13 = vld [vmem:[#allocation7 + $0x28] sm:$0xff]  ;;  %v189_v15 = vld [vmem:[#allocation7 + $0x30] sm:$0xff]  ;;  %s1213_s15 = scalar_lea.vmem %s674_s14, 128  ;;  %p1218_p13 = scmp.lt.s32.totalorder %s674_s14, %s674_s14 }
  0x5d   :  { %967 = vmatpush3.bf16.msra.mxu0 %v966_v4  ;;  %970 = vmatpush3.bf16.msra.mxu1 %v969_v8  ;;  %v975_v14 = vpack.c.bf16 %v188_v13, %v187_v12  ;;  %v190_v16 = vld [vmem:[#allocation7 + $0x38] sm:$0xff]  ;;  %v191_v18 = vld [vmem:[#allocation7 + $0x40] sm:$0xff]  ;;  %v192_v19 = vld [vmem:[#allocation7 + $0x48] sm:$0xff]  ;;  %p1214_p12 = scmp.ne.s32.totalorder %s674_s14, %s1213_s15  ;;  %p1219_p0 = scmp.lt.s32.totalorder %s1213_s15, %s1213_s15 }
  0x5e   :  { %992 = vmatprep.subr.bf16.mxu0 %v1250_v0  ;;  %971 = vmatprep.subr.bf16.mxu1 %v1250_v0  ;;  %v978_v17 = vpack.c.bf16 %v190_v16, %v189_v15  ;;  %v981_v20 = vpack.c.bf16 %v192_v19, %v191_v18  ;;  %v193_v21 = vld [vmem:[#allocation7 + $0x50] sm:$0xff]  ;;  %v194_v22 = vld [vmem:[#allocation7 + $0x58] sm:$0xff]  ;;  %v195_v24 = vld [vmem:[#allocation7 + $0x60] sm:$0xff] }
  0x5f   :  { %v984_v23 = vpack.c.bf16 %v194_v22, %v193_v21  ;;  %v196_v25 = vld [vmem:[#allocation7 + $0x68] sm:$0xff]  ;;  %v197_v27 = vld [vmem:[#allocation7 + $0x70] sm:$0xff]  ;;  %v198_v28 = vld [vmem:[#allocation7 + $0x78] sm:$0xff]  ;;  %p1220_p1 = por %p1219_p0, %p1218_p13 }
  0x60   :  { %788 = vmatmul.mubr.msk.f32.vlgmr.msra.gmra.mrb[0].mxu0 %vm109_vm1, %v99_v10  ;;  %v987_v26 = vpack.c.bf16 %v196_v25, %v195_v24  ;;  %v990_v29 = vpack.c.bf16 %v198_v28, %v197_v27  ;;  %v282_v30 = vld [vmem:[#allocation8] sm:$0xff]  ;;  %v283_v31 = vld [vmem:[#allocation8 + $0x8] sm:$0xff]  ;;  %v284_v32 = vld [vmem:[#allocation8 + $0x10] sm:$0xff] }
  0x61   :  { %857 = vmatprep.mubr.msk.f32.mxu0 %vm1251_vm0, %v1252_v1  ;;  %973 = vmatpush3.bf16.msra.mxu1 %v972_v11  ;;  %v993_v33 = vpack.c.bf16 %v283_v31, %v282_v30  ;;  %v285_v34 = vld [vmem:[#allocation8 + $0x18] sm:$0xff]  ;;  %v286_v36 = vld [vmem:[#allocation8 + $0x20] sm:$0xff]  ;;  %v287_v37 = vld [vmem:[#allocation8 + $0x28] sm:$0xff]  ;;  %p1221_p2 = pnand %p1220_p1, %p1214_p12 }
  0x62   :  { %974 = vmatprep.subr.bf16.mxu1 %v1250_v0  ;;  %v996_v35 = vpack.c.bf16 %v285_v34, %v284_v32  ;;  %v999_v38 = vpack.c.bf16 %v287_v37, %v286_v36  ;;  %v684_v39 = vld [vmem:[%s1469_s2] ss:$0 sm:$0xff]  ;;  %v288_v43 = vld [vmem:[#allocation8 + $0x30] sm:$0xff]  ;;  %v289_v44 = vld [vmem:[#allocation8 + $0x38] sm:$0xff] }
  0x63   :  { %994 = vmatpush3.bf16.msra.mxu0 %v993_v33  ;;  %v1002_v45 = vpack.c.bf16 %v289_v44, %v288_v43  ;;  %v290_v46 = vld [vmem:[#allocation8 + $0x40] sm:$0xff]  ;;  %v291_v47 = vld [vmem:[#allocation8 + $0x48] sm:$0xff]  ;;  %v292_v49 = vld [vmem:[#allocation8 + $0x50] sm:$0xff] }
  0x64   :  { %995 = vmatprep.subr.bf16.mxu0 %v1250_v0  ;;  %v1005_v48 = vpack.c.bf16 %v291_v47, %v290_v46  ;;  %v293_v50 = vld [vmem:[#allocation8 + $0x58] sm:$0xff]  ;;  %v294_v51 = vld [vmem:[#allocation8 + $0x60] sm:$0xff]  ;;  %v295_v53 = vld [vmem:[#allocation8 + $0x68] sm:$0xff] }
  0x65   :  { %976 = vmatpush3.bf16.msra.mxu1 %v975_v14  ;;  %v1008_v52 = vpack.c.bf16 %v293_v50, %v292_v49  ;;  %v1011_v54 = vpack.c.bf16 %v295_v53, %v294_v51  ;;  %v296_v55 = vld [vmem:[#allocation8 + $0x70] sm:$0xff]  ;;  %v297_v56 = vld [vmem:[#allocation8 + $0x78] sm:$0xff]  ;;  %v377_v58 = vld [vmem:[#allocation7 + $0x80] sm:$0xff] }
  0x66   :  { %977 = vmatprep.subr.bf16.mxu1 %v1250_v0  ;;  %v1014_v57 = vpack.c.bf16 %v297_v56, %v296_v55  ;;  %v378_v59 = vld [vmem:[#allocation7 + $0x88] sm:$0xff]  ;;  %v379_v60 = vld [vmem:[#allocation7 + $0x90] sm:$0xff]  ;;  %v380_v62 = vld [vmem:[#allocation7 + $0x98] sm:$0xff] }
  0x67   :  { %997 = vmatpush3.bf16.msra.mxu0 %v996_v35  ;;  %v1017_v61 = vpack.c.bf16 %v378_v59, %v377_v58  ;;  %v1020_v63 = vpack.c.bf16 %v380_v62, %v379_v60  ;;  %v381_v2 = vld [vmem:[#allocation7 + $0xa0] sm:$0xff]  ;;  %v382_v3 = vld [vmem:[#allocation7 + $0xa8] sm:$0xff]  ;;  %v383_v5 = vld [vmem:[#allocation7 + $0xb0] sm:$0xff] }
  0x68   :  { %998 = vmatprep.subr.bf16.mxu0 %v1250_v0  ;;  %v1023_v4 = vpack.c.bf16 %v382_v3, %v381_v2  ;;  %v384_v6 = vld [vmem:[#allocation7 + $0xb8] sm:$0xff]  ;;  %v385_v8 = vld [vmem:[#allocation7 + $0xc0] sm:$0xff]  ;;  %v386_v9 = vld [vmem:[#allocation7 + $0xc8] sm:$0xff] }
  0x69   :  { %979 = vmatpush3.bf16.msra.mxu1 %v978_v17  ;;  %v1026_v7 = vpack.c.bf16 %v384_v6, %v383_v5  ;;  %v1029_v10 = vpack.c.bf16 %v386_v9, %v385_v8  ;;  %v387_v11 = vld [vmem:[#allocation7 + $0xd0] sm:$0xff]  ;;  %v388_v12 = vld [vmem:[#allocation7 + $0xd8] sm:$0xff]  ;;  %v389_v14 = vld [vmem:[#allocation7 + $0xe0] sm:$0xff] }
  0x6a   :  { %980 = vmatprep.subr.bf16.mxu1 %v1250_v0  ;;  %v1032_v13 = vpack.c.bf16 %v388_v12, %v387_v11  ;;  %v390_v15 = vld [vmem:[#allocation7 + $0xe8] sm:$0xff]  ;;  %v392_v27 = vld [vmem:[#allocation7 + $0xf8] sm:$0xff]  ;;  %v480_v31 = vld [vmem:[#allocation8 + $0x90] sm:$0xff] }
  0x6b   :  { %1000 = vmatpush3.bf16.msra.mxu0 %v999_v38  ;;  %v1035_v16 = vpack.c.bf16 %v390_v15, %v389_v14  ;;  %v686_v17 = vld [vmem:[%s1471_s4] ss:$0 sm:$0xff]  ;;  %v481_v33 = vld [vmem:[#allocation8 + $0x98] sm:$0xff]  ;;  %v482_v35 = vld [vmem:[#allocation8 + $0xa0] sm:$0xff] }
  0x6c   :  { %1001 = vmatprep.subr.bf16.mxu0 %v1250_v0  ;;  %v479_v30 = vld [vmem:[#allocation8 + $0x88] sm:$0xff]  ;;  %v1044_v34 = vpack.c.bf16 %v481_v33, %v480_v31  ;;  %v484_v44 = vld [vmem:[#allocation8 + $0xb0] sm:$0xff]  ;;  %v486_v47 = vld [vmem:[#allocation8 + $0xc0] sm:$0xff] }
  0x6d   :  { %982 = vmatpush3.bf16.msra.mxu1 %v981_v20  ;;  %v483_v36 = vld [vmem:[#allocation8 + $0xa8] sm:$0xff]  ;;  %v488_v50 = vld [vmem:[#allocation8 + $0xd0] sm:$0xff]  ;;  %v490_v51 = vld [vmem:[#allocation8 + $0xe0] sm:$0xff] }
  0x6e   :  { %983 = vmatprep.subr.bf16.mxu1 %v1250_v0  ;;  %v1047_v37 = vpack.c.bf16 %v483_v36, %v482_v35  ;;  %v688_v38 = vld [vmem:[%s1473_s6] ss:$0 sm:$0xff]  ;;  %v493_v55 = vld [vmem:[#allocation8 + $0xf8] sm:$0xff]  ;;  %v575_v59 = vld [vmem:[#allocation10 + $0x10] sm:$0xff] }
  0x6f   :  { %1003 = vmatpush3.bf16.msra.mxu0 %v1002_v45  ;;  %v485_v45 = vld [vmem:[#allocation8 + $0xb8] sm:$0xff]  ;;  %v491_v53 = vld [vmem:[#allocation8 + $0xe8] sm:$0xff] }
  0x70   :  { %1004 = vmatprep.subr.bf16.mxu0 %v1250_v0  ;;  %v1050_v46 = vpack.c.bf16 %v485_v45, %v484_v44  ;;  %v574_v58 = vld [vmem:[#allocation10 + $0x8] sm:$0xff]  ;;  %v580_v5 = vld [vmem:[#allocation10 + $0x38] sm:$0xff] }
  0x71   :  { %985 = vmatpush3.bf16.msra.mxu1 %v984_v23  ;;  %v578_v2 = vld [vmem:[#allocation10 + $0x28] sm:$0xff]  ;;  %v584_v11 = vld [vmem:[#allocation10 + $0x58] sm:$0xff] }
  0x72   :  { %986 = vmatprep.subr.bf16.mxu1 %v1250_v0  ;;  %v582_v8 = vld [vmem:[#allocation10 + $0x48] sm:$0xff] }
  0x73   :  { %1006 = vmatpush3.bf16.msra.mxu0 %v1005_v48  ;;  %v487_v48 = vld [vmem:[#allocation8 + $0xc8] sm:$0xff] }
  0x74   :  { %1007 = vmatprep.subr.bf16.mxu0 %v1250_v0  ;;  %v1053_v49 = vpack.c.bf16 %v487_v48, %v486_v47  ;;  %v586_v14 = vld [vmem:[#allocation10 + $0x68] sm:$0xff] }
  0x75   :  { %988 = vmatpush3.bf16.msra.mxu1 %v987_v26  ;;  %v391_v26 = vld [vmem:[#allocation7 + $0xf0] sm:$0xff] }
  0x76   :  { %989 = vmatprep.subr.bf16.mxu1 %v1250_v0  ;;  %v1038_v28 = vpack.c.bf16 %v392_v27, %v391_v26  ;;  %v588_v26 = vld [vmem:[#allocation10 + $0x78] sm:$0xff] }
  0x77   :  { %1009 = vmatpush3.bf16.msra.mxu0 %v1008_v52 }
  0x78   :  { %1010 = vmatprep.subr.bf16.mxu0 %v1250_v0 }
  0x79   :  { %991 = vmatpush3.bf16.msra.mxu1 %v990_v29  ;;  %v478_v29 = vld [vmem:[#allocation8 + $0x80] sm:$0xff] }
  0x7a   :  { %1016 = vmatprep.subr.bf16.mxu1 %v1250_v0  ;;  %v1041_v32 = vpack.c.bf16 %v479_v30, %v478_v29 }
  0x7b   :  { %1012 = vmatpush3.bf16.msra.mxu0 %v1011_v54  ;;  %v1059_v54 = vpack.c.bf16 %v491_v53, %v490_v51 }
  0x7c   :  { %1013 = vmatprep.subr.bf16.mxu0 %v1250_v0 }
  0x7f   :  { %1015 = vmatpush3.bf16.msra.mxu0 %v1014_v57  ;;  %v573_v57 = vld [vmem:[#allocation10] sm:$0xff] }
  0x80   :  { %1040 = vmatprep.subr.bf16.mxu0 %v1250_v0  ;;  %v1065_v60 = vpack.c.bf16 %v574_v58, %v573_v57 }
 0x133   :  { %v179_v40 = vpop.f32.mrb[0].mxu0 }
 0x134   :  { %v1399_v41 = vadd.f32 %v684_v39, %v179_v40  ;;  %v789_v42 = vpop.f32.mrb[1].mxu0 }
 0x136   :  { %823 = vmatmul.mubr.f32.vlgmr.msra.gmra.mrb[0].mxu1 %v1399_v41 }
 0x137   :  { %892 = vmatprep.mubr.msk.f32.mxu1 %vm1251_vm0, %v1252_v1  ;;  %1018 = vmatpush3.bf16.msra.mxu1 %v1017_v61  ;;  %v576_v61 = vld [vmem:[#allocation10 + $0x18] sm:$0xff] }
 0x138   :  { %1019 = vmatprep.subr.bf16.mxu1 %v1250_v0  ;;  %v1068_v62 = vpack.c.bf16 %v576_v61, %v575_v59 }
 0x13b   :  { %1021 = vmatpush3.bf16.msra.mxu1 %v1020_v63  ;;  %v577_v63 = vld [vmem:[#allocation10 + $0x20] sm:$0xff] }
 0x13c   :  { %1022 = vmatprep.subr.bf16.mxu1 %v1250_v0  ;;  %v1071_v3 = vpack.c.bf16 %v578_v2, %v577_v63 }
 0x13f   :  { %1024 = vmatpush3.bf16.msra.mxu1 %v1023_v4  ;;  %v579_v4 = vld [vmem:[#allocation10 + $0x30] sm:$0xff] }
 0x140   :  { %1025 = vmatprep.subr.bf16.mxu1 %v1250_v0  ;;  %v1074_v6 = vpack.c.bf16 %v580_v5, %v579_v4 }
 0x143   :  { %1027 = vmatpush3.bf16.msra.mxu1 %v1026_v7  ;;  %v581_v7 = vld [vmem:[#allocation10 + $0x40] sm:$0xff] }
 0x144   :  { %1028 = vmatprep.subr.bf16.mxu1 %v1250_v0  ;;  %v1077_v9 = vpack.c.bf16 %v582_v8, %v581_v7 }
 0x147   :  { %1030 = vmatpush3.bf16.msra.mxu1 %v1029_v10  ;;  %v583_v10 = vld [vmem:[#allocation10 + $0x50] sm:$0xff] }
 0x148   :  { %1031 = vmatprep.subr.bf16.mxu1 %v1250_v0  ;;  %v1080_v12 = vpack.c.bf16 %v584_v11, %v583_v10 }
 0x14b   :  { %1033 = vmatpush3.bf16.msra.mxu1 %v1032_v13  ;;  %v585_v13 = vld [vmem:[#allocation10 + $0x60] sm:$0xff] }
 0x14c   :  { %1034 = vmatprep.subr.bf16.mxu1 %v1250_v0  ;;  %v1083_v15 = vpack.c.bf16 %v586_v14, %v585_v13 }
 0x14f   :  { %1036 = vmatpush3.bf16.msra.mxu1 %v1035_v16  ;;  %v690_v16 = vld [vmem:[%s1471_s4 + $0x1] ss:$0 sm:$0xff] }
 0x150   :  { %1037 = vmatprep.subr.bf16.mxu1 %v1250_v0 }
 0x153   :  { %1039 = vmatpush3.bf16.msra.mxu1 %v1038_v28 }
 0x154   :  { %1064 = vmatprep.subr.bf16.mxu1 %v1250_v0 }
 0x209   :  { %v272_v18 = vpop.f32.mrb[0].mxu1 }
 0x20a   :  { %v273_v19 = vadd.f32 %v686_v17, %v272_v18  ;;  %v824_v20 = vpop.f32.mrb[1].mxu1 }
 0x20c   :  { %v277_v21 = vmin.f32 %v273_v19, 0.0  ;;  %vm276_vm2 = vcmp.gt.f32.partialorder %v273_v19, 0.0 }
 0x20e   :  { %v278_v22 = vmul.f32 1.442695, %v277_v21 }
 0x210   :  { %1099 = vpow2.f32 %v278_v22 }
 0x21a   :  { %v1100_v23 = vpop.eup %1099 }
 0x21b   :  { %v687_v24 = vadd.f32 -1.0, %v1100_v23 }
 0x21d   :  { %v281_v25 = vsel %vm276_vm2, %v273_v19, %v687_v24 }
 0x21e   :  { %858 = vmatmul.mubr.f32.vlgmr.msra.gmra.mrb[2].mxu0 %v281_v25  ;;  %v587_v25 = vld [vmem:[#allocation10 + $0x70] sm:$0xff] }
 0x21f   :  { %927 = vmatprep.mubr.msk.f32.mxu0 %vm1251_vm0, %v1252_v1  ;;  %1042 = vmatpush3.bf16.msra.mxu0 %v1041_v32  ;;  %v1086_v27 = vpack.c.bf16 %v588_v26, %v587_v25  ;;  %v694_v32 = vld [vmem:[%s1475_s8] ss:$0 sm:$0xff] }
 0x220   :  { %1043 = vmatprep.subr.bf16.mxu0 %v1250_v0 }
 0x223   :  { %1045 = vmatpush3.bf16.msra.mxu0 %v1044_v34 }
 0x224   :  { %1046 = vmatprep.subr.bf16.mxu0 %v1250_v0 }
 0x227   :  { %1048 = vmatpush3.bf16.msra.mxu0 %v1047_v37 }
 0x228   :  { %1049 = vmatprep.subr.bf16.mxu0 %v1250_v0 }
 0x22b   :  { %1051 = vmatpush3.bf16.msra.mxu0 %v1050_v46 }
 0x22c   :  { %1052 = vmatprep.subr.bf16.mxu0 %v1250_v0 }
 0x22f   :  { %1054 = vmatpush3.bf16.msra.mxu0 %v1053_v49 }
 0x230   :  { %1055 = vmatprep.subr.bf16.mxu0 %v1250_v0 }
 0x2f1   :  { %v371_v39 = vpop.f32.mrb[2].mxu0 }
 0x2f2   :  { %v372_v40 = vadd.f32 %v688_v38, %v371_v39  ;;  %v859_v42 = vpop.f32.mrb[3].mxu0 }
 0x2f4   :  { %v1429_v43 = vadd.f32 %v372_v40, %v1399_v41  ;;  %v489_v41 = vld [vmem:[#allocation8 + $0xd8] sm:$0xff] }
 0x2f5   :  { %v1056_v52 = vpack.c.bf16 %v489_v41, %v488_v50 }
 0x2f6   :  { %893 = vmatmul.mubr.f32.vlgmr.msra.gmra.mrb[2].mxu1 %v1429_v43 }
 0x2f7   :  { %962 = vmatprep.mubr.msk.f32.mxu1 %vm1251_vm0, %v1252_v1  ;;  %1057 = vmatpush3.bf16.msra.mxu0 %v1056_v52  ;;  %v492_v1 = vld [vmem:[#allocation8 + $0xf0] sm:$0xff] }
 0x2f8   :  { %1058 = vmatprep.subr.bf16.mxu0 %v1250_v0  ;;  %v1062_v56 = vpack.c.bf16 %v493_v55, %v492_v1  ;;  %1066 = vmatpush3.bf16.msra.mxu1 %v1065_v60 }
 0x2f9   :  { %1067 = vmatprep.subr.bf16.mxu1 %v1250_v0 }
 0x2fb   :  { %1060 = vmatpush3.bf16.msra.mxu0 %v1059_v54 }
 0x2fc   :  { %1061 = vmatprep.subr.bf16.mxu0 %v1250_v0  ;;  %1069 = vmatpush3.bf16.msra.mxu1 %v1068_v62 }
 0x2fd   :  { %1070 = vmatprep.subr.bf16.mxu1 %v1250_v0 }
 0x2ff   :  { %1063 = vmatpush3.bf16.msra.mxu0 %v1062_v56 }
 0x300   :  { %1072 = vmatpush3.bf16.msra.mxu1 %v1071_v3 }
 0x301   :  { %1073 = vmatprep.subr.bf16.mxu1 %v1250_v0 }
 0x304   :  { %1075 = vmatpush3.bf16.msra.mxu1 %v1074_v6 }
 0x305   :  { %1076 = vmatprep.subr.bf16.mxu1 %v1250_v0 }
 0x308   :  { %1078 = vmatpush3.bf16.msra.mxu1 %v1077_v9 }
 0x309   :  { %1079 = vmatprep.subr.bf16.mxu1 %v1250_v0 }
 0x30c   :  { %1081 = vmatpush3.bf16.msra.mxu1 %v1080_v12 }
 0x30d   :  { %1082 = vmatprep.subr.bf16.mxu1 %v1250_v0 }
 0x310   :  { %1084 = vmatpush3.bf16.msra.mxu1 %v1083_v15 }
 0x311   :  { %1085 = vmatprep.subr.bf16.mxu1 %v1250_v0  ;;  %v693_v0 = vld [vmem:[%s1473_s6 + $0x1] ss:$0 sm:$0xff] }
 0x314   :  { %1087 = vmatpush3.bf16.msra.mxu1 %v1086_v27 }
 0x3c9   :  { %v467_v17 = vpop.f32.mrb[2].mxu1 }
 0x3ca   :  { %v468_v18 = vadd.f32 %v690_v16, %v467_v17  ;;  %v894_v19 = vpop.f32.mrb[3].mxu1 }
 0x3cc   :  { %v472_v20 = vmin.f32 %v468_v18, 0.0  ;;  %vm471_vm3 = vcmp.gt.f32.partialorder %v468_v18, 0.0 }
 0x3ce   :  { %v473_v21 = vmul.f32 1.442695, %v472_v20 }
 0x3d0   :  { %1101 = vpow2.f32 %v473_v21 }
 0x3da   :  { %v1102_v22 = vpop.eup %1101 }
 0x3db   :  { %v691_v23 = vadd.f32 -1.0, %v1102_v22 }
 0x3dd   :  { %v476_v24 = vsel %vm471_vm3, %v468_v18, %v691_v23 }
 0x3de   :  { %928 = vmatmul.mubr.f32.vlgmr.msra.gmra.mrb[4].mxu0 %v476_v24 }
 0x4b1   :  { %v568_v28 = vpop.f32.mrb[4].mxu0 }
 0x4b2   :  { %v569_v29 = vadd.f32 %v693_v0, %v568_v28  ;;  %v929_v30 = vpop.f32.mrb[5].mxu0 }
 0x4b4   :  { %v572_v31 = vadd.f32 %v569_v29, %v1429_v43 }
 0x4b6   :  { %963 = vmatmul.mubr.f32.vlgmr.msra.gmra.mrb[4].mxu1 %v572_v31 }
 0x589   :  { %v662_v33 = vpop.f32.mrb[4].mxu1 }
 0x58a   :  { %v663_v34 = vadd.f32 %v694_v32, %v662_v33  ;;  %v964_v35 = vpop.f32.mrb[5].mxu1 }
 0x58c   :  { %666 = vst [vmem:[#allocation11] sm:$0xff] %v663_v34 }
 0x58d   :  { %1224 = shalt.err (!%p1221_p2)
}
 0x58e   :  { %s1225_s26 = scalar_lea.hbm %s1476_s9, 128 }
 0x58f   :  { %p1226_p3 = scmp.ne.s32.totalorder %s1476_s9, %s1225_s26  ;;  %p1229_p4 = scmp.lt.u32.totalorder %s1225_s26, %s1476_s9 }
 0x591   :  { %p1231_p5 = pnand %p1229_p4, %p1226_p3 }
 0x593   :  { %1234 = shalt.err (!%p1231_p5)
}
 0x594   :  { %676 = dma.vmem_to_hbm [thread:$0]  %s674_s14, 128, %s1476_s9, [#allocation4]  }
 0x595   :  { %1241 = dma.done.wait [#allocation4], 128  }
 0x596   :  { %1242 = vsyncadd [#allocation4], 4294967168 }
 0x597   :  { %680 = vsyncpa [#allocation3], 1 }
 0x598   :  { %681 = vsyncpa [#allocation6], 1 }
 0x599   :  { %682 = vsyncpa [#allocation9], 1 }
 0x59a   :  { %683 = vsyncpa [#allocation4], 1 }

</bundles_post_ra>
